<compile_context>
chip_gen: v6e
topology: v6e:2x2x1
jax: 0.10.0
libtpu: 0.0.40
codegen_flags: <defaults>
</compile_context>

<pallas_src>
import functools

import jax
import jax.numpy as jnp
from jax.experimental import pallas as pl
from jax.experimental.pallas import tpu as pltpu

_LANES = 128


def _chip_vmem_bytes():
    """Physical VMEM per TensorCore (falls back to the smallest, v7x's 64 MiB)."""
    try:
        info = pltpu.get_tpu_info()
        cap = getattr(info, "vmem_capacity_bytes", None)
        if cap:
            return int(cap)
    except Exception:
        pass
    return 64 << 20


def _pick_s_tile(C, S, x_itemsize, t_itemsize, vmem_cap):
    """Spatial sublane-tile size (block = (1, C, s_tile, 128)).

    Sized against ~45% of the chip's VMEM, counting double-buffered logits and
    targets plus headroom for f32 in-kernel temporaries, capped at 64 sublanes
    (8192 lanes per block) so per-step overhead is well amortized."""
    if S <= 8:
        return max(1, S)
    budget = int(vmem_cap * 0.45)
    per_row = (2 * C * _LANES * x_itemsize      # logits, double buffered
               + 2 * _LANES * t_itemsize        # targets, double buffered
               + 4 * C * _LANES * 4             # f32 temporaries headroom
               + 8 * _LANES * 4)                # accumulators / outputs
    st = budget // max(per_row, 1)
    st = (st // 8) * 8
    st = max(8, min(64, st))
    st = min(st, (S // 8) * 8)
    return max(8, int(st))


def _pick_j_outer(num_j, n):
    """Extra parallel split of the spatial tiles so small-N still feeds 2 TCs (v7x)."""
    if num_j <= 1 or n >= 4:
        return 1
    best = 1
    for d in range(2, min(num_j, 8) + 1):
        if num_j % d == 0:
            best = d
            if n * d >= 4:
                break
    return best


def _tile_losses(ignore_index, hw, sblk, x_ref, t_ref, w_ref):
    """Per-tile losses. Returns (per_elem_loss, per_elem_weight), each (S_T, 128) f32."""
    x = x_ref[0]                                      # (C, S_T, 128) native dtype
    t = t_ref[0].astype(jnp.int32)                    # (S_T, 128)
    C, ST, L = x.shape

    # Global flat spatial position; masks padded columns and partial tiles.
    row = jax.lax.broadcasted_iota(jnp.int32, (ST, L), 0)
    lane = jax.lax.broadcasted_iota(jnp.int32, (ST, L), 1)
    pos = (sblk * ST + row) * L + lane
    # Targets outside [0, C) other than ignore_index contribute zero loss
    # (torch would raise; documented divergence).
    valid = (pos < hw) & (t != ignore_index) & (t >= 0) & (t < C)

    # Numerically stable log-sum-exp over the class (leading, non-vreg) axis:
    # pure per-vreg VPU max/add, exp on the EUP.
    m = jnp.max(x, axis=0)                            # (S_T, 128) native dtype
    m32 = m.astype(jnp.float32)
    e = jnp.exp(x.astype(jnp.float32) - m32[None, :, :])
    lse = jnp.log(jnp.sum(e, axis=0)) + m32           # (S_T, 128) f32

    # One-hot gather of the target logit (and its class weight) -- keep the
    # select-literal-0 form so garbage in invalid lanes cannot propagate.
    cls = jax.lax.broadcasted_iota(jnp.int32, (C, ST, L), 0)
    oh = cls == t[None, :, :]
    picked = jnp.sum(jnp.where(oh, x, jnp.zeros((), x.dtype)),
                     axis=0).astype(jnp.float32)
    nll = lse - picked

    if w_ref is not None:
        wv = w_ref[...]                               # (C, 1, 128) f32
        wt = jnp.sum(jnp.where(oh, wv, 0.0), axis=0)  # (S_T, 128) f32
        per = jnp.where(valid, wt * nll, 0.0)
        wrow = jnp.where(valid, wt, 0.0)
    else:
        per = jnp.where(valid, nll, 0.0)
        wrow = valid.astype(jnp.float32)
    return per, wrow


def _ce_sums_kernel(ignore_index, hw, j_inner, has_weight, need_wsum, *refs):
    """mean/sum path: lane-dense per-(sample, j_outer) accumulators, no per-row HBM out."""
    idx = 0
    x_ref = refs[idx]; idx += 1
    t_ref = refs[idx]; idx += 1
    w_ref = None
    if has_weight:
        w_ref = refs[idx]; idx += 1
    lsum_ref = refs[idx]; idx += 1
    wsum_ref = refs[idx] if need_wsum else None

    ji = pl.program_id(2)
    sblk = pl.program_id(1) * j_inner + ji

    @pl.when(ji == 0)
    def _():
        lsum_ref[...] = jnp.zeros_like(lsum_ref)
        if need_wsum:
            wsum_ref[...] = jnp.zeros_like(wsum_ref)

    per, wrow = _tile_losses(ignore_index, hw, sblk, x_ref, t_ref, w_ref)
    lsum_ref[...] += per.reshape(lsum_ref.shape)       # pure VPU adds
    if need_wsum:
        wsum_ref[...] += wrow.reshape(wsum_ref.shape)


def _ce_none_kernel(ignore_index, hw, has_weight, *refs):
    """reduction='none' path: lane-dense per-element losses, fully parallel grid."""
    idx = 0
    x_ref = refs[idx]; idx += 1
    t_ref = refs[idx]; idx += 1
    w_ref = None
    if has_weight:
        w_ref = refs[idx]; idx += 1
    out_ref = refs[idx]
    sblk = pl.program_id(1)
    per, _ = _tile_losses(ignore_index, hw, sblk, x_ref, t_ref, w_ref)
    out_ref[...] = per.reshape(out_ref.shape).astype(out_ref.dtype)


def standard_cross_entropy_loss(logits_nchw, target, weight=None, *,
                                ignore_index=-100, reduction='mean',
                                loss_weight=1.0, s_tile=None):
    """JAX/Pallas equivalent of StandardCrossEntropyLoss.forward (logits NCHW).

    Note: reduction='mean' with every target == ignore_index yields 0/0 = NaN,
    matching torch.nn.functional.cross_entropy.
    """
    assert reduction in ('mean', 'sum', 'none')
    N, C, H, W = logits_nchw.shape
    HW = H * W
    HWp = -(-HW // _LANES) * _LANES
    S = HWp // _LANES

    # Free reshapes of the native layout; padding only for HW not multiple of 128.
    x3 = logits_nchw.reshape(N, C, HW)
    t2 = target.reshape(N, HW)
    if jnp.dtype(t2.dtype) not in (jnp.dtype(jnp.int32), jnp.dtype(jnp.int16)):
        t2 = t2.astype(jnp.int32)
    if HWp != HW:
        x3 = jnp.pad(x3, ((0, 0), (0, 0), (0, HWp - HW)))
        t2 = jnp.pad(t2, ((0, 0), (0, HWp - HW)))
    x4 = x3.reshape(N, C, S, _LANES)
    t3 = t2.reshape(N, S, _LANES)

    x_item = jnp.dtype(x4.dtype).itemsize
    t_item = jnp.dtype(t3.dtype).itemsize
    vmem_cap = _chip_vmem_bytes()
    if s_tile is None:
        s_tile = _pick_s_tile(C, S, x_item, t_item, vmem_cap)
    num_j = -(-S // s_tile)

    has_weight = weight is not None
    inputs = [x4, t3]
    if has_weight:
        w = jnp.asarray(weight, jnp.float32).reshape(C, 1, 1)
        inputs.append(jnp.broadcast_to(w, (C, 1, _LANES)))   # tiny; gathered in-kernel

    # Padding-aware VMEM estimate (double-buffered inputs + f32 temp headroom).
    c_pad8 = -(-C // 8) * 8
    xb = C * s_tile * _LANES * x_item
    tb = s_tile * _LANES * t_item
    wb = (c_pad8 * 8 * _LANES * 4) if has_weight else 0
    tmp = 4 * C * s_tile * _LANES * 4
    vmem_hi = int(vmem_cap * 0.8)

    if reduction == 'none':
        ob = s_tile * _LANES * x_item
        est = 2 * (xb + tb + wb + ob) + tmp + (2 << 20)
        vmem_limit = int(min(max(est, 32 << 20), vmem_hi))
        kernel = functools.partial(_ce_none_kernel, ignore_index, HW, has_weight)
        in_specs = [pl.BlockSpec((1, C, s_tile, _LANES), lambda n, j: (n, 0, j, 0)),
                    pl.BlockSpec((1, s_tile, _LANES), lambda n, j: (n, j, 0))]
        if has_weight:
            in_specs.append(pl.BlockSpec((C, 1, _LANES), lambda n, j: (0, 0, 0)))
        rows = pl.pallas_call(
            kernel,
            out_shape=jax.ShapeDtypeStruct((N, S, _LANES), x4.dtype),
            grid_spec=pltpu.PrefetchScalarGridSpec(
                num_scalar_prefetch=0, grid=(N, num_j),
                in_specs=in_specs,
                out_specs=pl.BlockSpec((1, s_tile, _LANES), lambda n, j: (n, j, 0))),
            compiler_params=pltpu.CompilerParams(
                dimension_semantics=("parallel", "parallel"),
                vmem_limit_bytes=vmem_limit),
        )(*inputs)
        rows = rows.reshape(N, HWp)[:, :HW].reshape(target.shape)
        return loss_weight * rows

    need_wsum = (reduction == 'mean')
    j_outer = _pick_j_outer(num_j, N)
    j_inner = num_j // j_outer

    n_acc = 2 if need_wsum else 1
    ob = n_acc * s_tile * _LANES * 4
    est = 2 * (xb + tb + wb + ob) + tmp + (2 << 20)
    vmem_limit = int(min(max(est, 32 << 20), vmem_hi))

    kernel = functools.partial(_ce_sums_kernel, ignore_index, HW, j_inner,
                               has_weight, need_wsum)
    in_specs = [pl.BlockSpec((1, C, s_tile, _LANES),
                             lambda n, jo, ji: (n, 0, jo * j_inner + ji, 0)),
                pl.BlockSpec((1, s_tile, _LANES),
                             lambda n, jo, ji: (n, jo * j_inner + ji, 0))]
    if has_weight:
        in_specs.append(pl.BlockSpec((C, 1, _LANES), lambda n, jo, ji: (0, 0, 0)))

    acc_shape = jax.ShapeDtypeStruct((N, j_outer, s_tile, _LANES), jnp.float32)
    acc_spec = pl.BlockSpec((1, 1, s_tile, _LANES), lambda n, jo, ji: (n, jo, 0, 0))
    out_shape = [acc_shape]
    out_specs = [acc_spec]
    if need_wsum:
        out_shape.append(acc_shape)
        out_specs.append(pl.BlockSpec((1, 1, s_tile, _LANES),
                                      lambda n, jo, ji: (n, jo, 0, 0)))

    outs = pl.pallas_call(
        kernel,
        out_shape=tuple(out_shape),
        grid_spec=pltpu.PrefetchScalarGridSpec(
            num_scalar_prefetch=0, grid=(N, j_outer, j_inner),
            in_specs=in_specs, out_specs=tuple(out_specs)),
        compiler_params=pltpu.CompilerParams(
            dimension_semantics=("parallel", "parallel", "arbitrary"),
            vmem_limit_bytes=vmem_limit),
    )(*inputs)

    if need_wsum:
        lsum, wsum = outs
        loss = jnp.sum(lsum) / jnp.sum(wsum)
    else:
        lsum = outs[0] if isinstance(outs, (tuple, list)) else outs
        loss = jnp.sum(lsum)
    return loss_weight * loss


def _reference_loss(logits_nchw, target, weight=None, *,
                    ignore_index=-100, reduction='mean', loss_weight=1.0):
    """Pure-JAX reference matching torch.nn.functional.cross_entropy."""
    N, C, H, W = logits_nchw.shape
    x = jnp.transpose(logits_nchw, (0, 2, 3, 1)).reshape(-1, C).astype(jnp.float32)
    t = target.reshape(-1).astype(jnp.int32)
    w = jnp.ones((C,), jnp.float32) if weight is None else jnp.asarray(weight, jnp.float32)
    logp = jax.nn.log_softmax(x, axis=-1)
    valid = t != ignore_index
    t_safe = jnp.where(valid, t, 0)
    picked = jnp.take_along_axis(logp, t_safe[:, None], axis=-1)[:, 0]
    wt = w[t_safe]
    per = jnp.where(valid, -wt * picked, 0.0)
    if reduction == 'mean':
        loss = per.sum() / jnp.where(valid, wt, 0.0).sum()
    elif reduction == 'sum':
        loss = per.sum()
    else:
        loss = per.reshape(target.shape)
    return loss_weight * loss


if __name__ == "__main__":
    key = jax.random.PRNGKey(0)
    k1, k2, k3 = jax.random.split(key, 3)

    N, C, H, W = 2, 4, 16, 16
    logits = jax.random.normal(k1, (N, C, H, W), dtype=jnp.float32)
    target = jax.random.randint(k2, (N, H, W), 0, C, dtype=jnp.int32)
    # Sprinkle some ignore_index entries.
    ignore_mask = jax.random.uniform(k3, (N, H, W)) < 0.1
    target = jnp.where(ignore_mask, jnp.int32(-100), target)

    # Default module config: ignore_index=-100, reduction='mean', weight=None.
    loss = jax.block_until_ready(standard_cross_entropy_loss(logits, target))
    ref = _reference_loss(logits, target)
    assert jnp.allclose(loss, ref, atol=1e-5, rtol=1e-5), (loss, ref)

    class_w = jnp.array([0.5, 1.0, 2.0, 1.5], jnp.float32)

    # Weighted mean.
    loss_m = jax.block_until_ready(
        standard_cross_entropy_loss(logits, target, weight=class_w))
    ref_m = _reference_loss(logits, target, weight=class_w)
    assert jnp.allclose(loss_m, ref_m, atol=1e-5, rtol=1e-5), (loss_m, ref_m)

    # Weighted sum with a loss_weight.
    loss_s = jax.block_until_ready(
        standard_cross_entropy_loss(logits, target, weight=class_w,
                                    reduction='sum', loss_weight=0.7))
    ref_s = _reference_loss(logits, target, weight=class_w,
                            reduction='sum', loss_weight=0.7)
    assert jnp.allclose(loss_s, ref_s, atol=1e-4, rtol=1e-5), (loss_s, ref_s)

    # Per-element losses (reduction='none') with class weights.
    loss_n = jax.block_until_ready(
        standard_cross_entropy_loss(logits, target, weight=class_w, reduction='none'))
    ref_n = _reference_loss(logits, target, weight=class_w, reduction='none')
    assert jnp.allclose(loss_n, ref_n, atol=1e-5, rtol=1e-5)

    print("KERNEL_OK")
</pallas_src>

<mosaic_0001>
module attributes {stable_mosaic.version = 11 : i64} {
  func.func @_ce_sums_kernel(%arg0: i32, %arg1: i32, %arg2: i32, %arg3: memref<1x4x2x128xf32, #tpu.memory_space<vmem>>, %arg4: memref<1x2x128xi32, #tpu.memory_space<vmem>>, %arg5: memref<1x1x2x128xf32, #tpu.memory_space<vmem>>, %arg6: memref<1x1x2x128xf32, #tpu.memory_space<vmem>>) attributes {dimension_semantics = [#tpu.dimension_semantics<parallel>, #tpu.dimension_semantics<parallel>, #tpu.dimension_semantics<arbitrary>], iteration_bounds = array<i64: 2, 1, 1>, scalar_prefetch = 0 : i64, scratch_operands = 0 : i64, tpu.core_type = #tpu.core_type<tc>, window_params = [{transform_indices = @transform_0, window_bounds = array<i64: 1, 4, 2, 128>}, {transform_indices = @transform_1, window_bounds = array<i64: 1, 2, 128>}, {transform_indices = @transform_2, window_bounds = array<i64: 1, 1, 2, 128>}, {transform_indices = @transform_3, window_bounds = array<i64: 1, 1, 2, 128>}]} {
    %c1_i32 = arith.constant 1 : i32
    %0 = arith.muli %arg1, %c1_i32 : i32
    %1 = arith.addi %0, %arg2 : i32
    %c0_i32 = arith.constant 0 : i32
    %2 = arith.cmpi eq, %arg2, %c0_i32 : i32
    %3 = arith.extui %2 : i1 to i32
    %c0_i32_0 = arith.constant 0 : i32
    %4 = arith.cmpi ne, %3, %c0_i32_0 : i32
    scf.if %4 {
      %cst_28 = arith.constant 0.000000e+00 : f32
      %56 = vector.broadcast %cst_28 : f32 to vector<1x1x2x128xf32>
      %c0_29 = arith.constant 0 : index
      %c0_30 = arith.constant 0 : index
      %c0_31 = arith.constant 0 : index
      %c0_32 = arith.constant 0 : index
      %57 = vector.load %arg5[%c0_29, %c0_30, %c0_31, %c0_32] : memref<1x1x2x128xf32, #tpu.memory_space<vmem>>, vector<1x1x2x128xf32>
      tpu.vector_store %arg5[%c0_29, %c0_30, %c0_31, %c0_32], %56 {strides = array<i32>} : memref<1x1x2x128xf32, #tpu.memory_space<vmem>>, vector<1x1x2x128xf32>,
      %cst_33 = arith.constant 0.000000e+00 : f32
      %58 = vector.broadcast %cst_33 : f32 to vector<1x1x2x128xf32>
      %c0_34 = arith.constant 0 : index
      %c0_35 = arith.constant 0 : index
      %c0_36 = arith.constant 0 : index
      %c0_37 = arith.constant 0 : index
      %59 = vector.load %arg6[%c0_34, %c0_35, %c0_36, %c0_37] : memref<1x1x2x128xf32, #tpu.memory_space<vmem>>, vector<1x1x2x128xf32>
      tpu.vector_store %arg6[%c0_34, %c0_35, %c0_36, %c0_37], %58 {strides = array<i32>} : memref<1x1x2x128xf32, #tpu.memory_space<vmem>>, vector<1x1x2x128xf32>,
    } else {
    }
    %c0 = arith.constant 0 : index
    %c0_1 = arith.constant 0 : index
    %c0_2 = arith.constant 0 : index
    %c0_3 = arith.constant 0 : index
    %5 = vector.load %arg3[%c0, %c0_1, %c0_2, %c0_3] : memref<1x4x2x128xf32, #tpu.memory_space<vmem>>, vector<1x4x2x128xf32>
    %6 = vector.shape_cast %5 : vector<1x4x2x128xf32> to vector<4x2x128xf32>
    %c0_4 = arith.constant 0 : index
    %c0_5 = arith.constant 0 : index
    %c0_6 = arith.constant 0 : index
    %7 = vector.load %arg4[%c0_4, %c0_5, %c0_6] : memref<1x2x128xi32, #tpu.memory_space<vmem>>, vector<1x2x128xi32>
    %8 = vector.shape_cast %7 : vector<1x2x128xi32> to vector<2x128xi32>
    %9 = tpu.iota {dimensions = array<i32: 0>} : vector<2x128xi32>
    %10 = tpu.iota {dimensions = array<i32: 1>} : vector<2x128xi32>
    %c2_i32 = arith.constant 2 : i32
    %11 = arith.muli %1, %c2_i32 : i32
    %12 = vector.broadcast %11 : i32 to vector<2x128xi32>
    %13 = arith.addi %12, %9 : vector<2x128xi32>
    %c128_i32 = arith.constant 128 : i32
    %14 = vector.broadcast %c128_i32 : i32 to vector<2x128xi32>
    %15 = arith.muli %13, %14 : vector<2x128xi32>
    %16 = arith.addi %15, %10 : vector<2x128xi32>
    %c256_i32 = arith.constant 256 : i32
    %17 = vector.broadcast %c256_i32 : i32 to vector<2x128xi32>
    %18 = arith.cmpi slt, %16, %17 : vector<2x128xi32>
    %c-100_i32 = arith.constant -100 : i32
    %19 = vector.broadcast %c-100_i32 : i32 to vector<2x128xi32>
    %20 = arith.cmpi ne, %8, %19 : vector<2x128xi32>
    %21 = arith.andi %18, %20 : vector<2x128xi1>
    %c0_i32_7 = arith.constant 0 : i32
    %22 = vector.broadcast %c0_i32_7 : i32 to vector<2x128xi32>
    %23 = arith.cmpi sge, %8, %22 : vector<2x128xi32>
    %24 = arith.andi %21, %23 : vector<2x128xi1>
    %c4_i32 = arith.constant 4 : i32
    %25 = vector.broadcast %c4_i32 : i32 to vector<2x128xi32>
    %26 = arith.cmpi slt, %8, %25 : vector<2x128xi32>
    %27 = arith.andi %24, %26 : vector<2x128xi1>
    %cst = arith.constant dense<0xFF800000> : vector<2x128xf32>
    %28 = vector.multi_reduction <maximumf>, %6, %cst [0] : vector<4x2x128xf32> to vector<2x128xf32>
    %29 = vector.shape_cast %28 : vector<2x128xf32> to vector<1x2x128xf32>
    %30 = vector.broadcast %29 : vector<1x2x128xf32> to vector<4x2x128xf32>
    %31 = arith.subf %6, %30 : vector<4x2x128xf32>
    %32 = math.exp %31 : vector<4x2x128xf32>
    %cst_8 = arith.constant dense<0.000000e+00> : vector<2x128xf32>
    %33 = vector.multi_reduction <add>, %32, %cst_8 [0] : vector<4x2x128xf32> to vector<2x128xf32>
    %34 = math.log %33 : vector<2x128xf32>
    %35 = arith.addf %34, %28 : vector<2x128xf32>
    %36 = tpu.iota {dimensions = array<i32: 0>} : vector<4x2x128xi32>
    %37 = vector.shape_cast %8 : vector<2x128xi32> to vector<1x2x128xi32>
    %38 = vector.broadcast %37 : vector<1x2x128xi32> to vector<4x2x128xi32>
    %39 = arith.cmpi eq, %36, %38 : vector<4x2x128xi32>
    %cst_9 = arith.constant 0.000000e+00 : f32
    %40 = vector.broadcast %cst_9 : f32 to vector<4x2x128xf32>
    %41 = arith.select %39, %6, %40 : vector<4x2x128xi1>, vector<4x2x128xf32>
    %cst_10 = arith.constant dense<0.000000e+00> : vector<2x128xf32>
    %42 = vector.multi_reduction <add>, %41, %cst_10 [0] : vector<4x2x128xf32> to vector<2x128xf32>
    %43 = arith.subf %35, %42 : vector<2x128xf32>
    %cst_11 = arith.constant 0.000000e+00 : f32
    %44 = vector.broadcast %cst_11 : f32 to vector<2x128xf32>
    %45 = arith.select %27, %43, %44 : vector<2x128xi1>, vector<2x128xf32>
    %46 = arith.extui %27 : vector<2x128xi1> to vector<2x128xi32>
    %47 = arith.sitofp %46 : vector<2x128xi32> to vector<2x128xf32>
    %c0_12 = arith.constant 0 : index
    %c0_13 = arith.constant 0 : index
    %c0_14 = arith.constant 0 : index
    %c0_15 = arith.constant 0 : index
    %48 = vector.load %arg5[%c0_12, %c0_13, %c0_14, %c0_15] : memref<1x1x2x128xf32, #tpu.memory_space<vmem>>, vector<1x1x2x128xf32>
    %49 = vector.shape_cast %45 : vector<2x128xf32> to vector<1x1x2x128xf32>
    %50 = arith.addf %48, %49 : vector<1x1x2x128xf32>
    %c0_16 = arith.constant 0 : index
    %c0_17 = arith.constant 0 : index
    %c0_18 = arith.constant 0 : index
    %c0_19 = arith.constant 0 : index
    %51 = vector.load %arg5[%c0_16, %c0_17, %c0_18, %c0_19] : memref<1x1x2x128xf32, #tpu.memory_space<vmem>>, vector<1x1x2x128xf32>
    tpu.vector_store %arg5[%c0_16, %c0_17, %c0_18, %c0_19], %50 {strides = array<i32>} : memref<1x1x2x128xf32, #tpu.memory_space<vmem>>, vector<1x1x2x128xf32>,
    %c0_20 = arith.constant 0 : index
    %c0_21 = arith.constant 0 : index
    %c0_22 = arith.constant 0 : index
    %c0_23 = arith.constant 0 : index
    %52 = vector.load %arg6[%c0_20, %c0_21, %c0_22, %c0_23] : memref<1x1x2x128xf32, #tpu.memory_space<vmem>>, vector<1x1x2x128xf32>
    %53 = vector.shape_cast %47 : vector<2x128xf32> to vector<1x1x2x128xf32>
    %54 = arith.addf %52, %53 : vector<1x1x2x128xf32>
    %c0_24 = arith.constant 0 : index
    %c0_25 = arith.constant 0 : index
    %c0_26 = arith.constant 0 : index
    %c0_27 = arith.constant 0 : index
    %55 = vector.load %arg6[%c0_24, %c0_25, %c0_26, %c0_27] : memref<1x1x2x128xf32, #tpu.memory_space<vmem>>, vector<1x1x2x128xf32>
    tpu.vector_store %arg6[%c0_24, %c0_25, %c0_26, %c0_27], %54 {strides = array<i32>} : memref<1x1x2x128xf32, #tpu.memory_space<vmem>>, vector<1x1x2x128xf32>,
    return
  }
  func.func @transform_0(%arg0: i32, %arg1: i32, %arg2: i32) -> (i32, i32, i32, i32) {
    %c1_i32 = arith.constant 1 : i32
    %0 = arith.muli %arg1, %c1_i32 : i32
    %1 = arith.addi %0, %arg2 : i32
    %c0_i32 = arith.constant 0 : i32
    %c0_i32_0 = arith.constant 0 : i32
    %c0_i32_1 = arith.constant 0 : i32
    return %arg0, %c0_i32, %1, %c0_i32_0 : i32, i32, i32, i32
  }
  func.func @transform_1(%arg0: i32, %arg1: i32, %arg2: i32) -> (i32, i32, i32) {
    %c1_i32 = arith.constant 1 : i32
    %0 = arith.muli %arg1, %c1_i32 : i32
    %1 = arith.addi %0, %arg2 : i32
    %c0_i32 = arith.constant 0 : i32
    %c0_i32_0 = arith.constant 0 : i32
    return %arg0, %1, %c0_i32 : i32, i32, i32
  }
  func.func @transform_2(%arg0: i32, %arg1: i32, %arg2: i32) -> (i32, i32, i32, i32) {
    %c0_i32 = arith.constant 0 : i32
    %c0_i32_0 = arith.constant 0 : i32
    %c0_i32_1 = arith.constant 0 : i32
    return %arg0, %arg1, %c0_i32, %c0_i32_0 : i32, i32, i32, i32
  }
  func.func @transform_3(%arg0: i32, %arg1: i32, %arg2: i32) -> (i32, i32, i32, i32) {
    %c0_i32 = arith.constant 0 : i32
    %c0_i32_0 = arith.constant 0 : i32
    %c0_i32_1 = arith.constant 0 : i32
    return %arg0, %arg1, %c0_i32, %c0_i32_0 : i32, i32, i32, i32
  }
}

</mosaic_0001>

<bundles_post_ra>
// kernel: tpu_custom_call.1
= control target key start
LH: loop header
LB: loop body
LE: loop exit
PB: predicated region body
PF: predicated region fallthrough
CT: control target
= control target key end

     0   :  { %s1102_s0 = inlined_call_operand.hbm [shape: f32[2,4,2,128], index: 0, kind: input, shape index: {}]   ;;  %s1103_s1 = inlined_call_operand.hbm [shape: s32[2,2,128], index: 1, kind: input, shape index: {}]   ;;  %s1104_s2 = inlined_call_operand.hbm [shape: f32[2,1,2,128], index: 2, kind: output, shape index: {0}]   ;;  %s1105_s3 = inlined_call_operand.hbm [shape: f32[2,1,2,128], index: 3, kind: output, shape index: {1}]  }
   0x1   :  { %1106 = sst [smem:[#allocation14_spill]] %s1102_s0 }
   0x2   :  { %9 = vsyncpa [#allocation3], 0 }
   0x3   :  { %11 = vsyncpa [#allocation3 + $0x1], 0 }
   0x4   :  { %12 = vsyncpa [#allocation6], 0 }
   0x5   :  { %14 = vsyncpa [#allocation6 + $0x1], 0 }
   0x6   :  { %15 = vsyncpa [#allocation4], 0 }
   0x7   :  { %17 = vsyncpa [#allocation4 + $0x1], 0 }
   0x8   :  { %18 = vsyncpa [#allocation9], 0 }
   0x9   :  { %20 = vsyncpa [#allocation9 + $0x1], 0  ;;  %s840_s12 = smov 0   ;;  %s842_s13 = smov 0  }
   0xa   :  { %s844_s14 = smov 0   ;;  %s846_s15 = smov 0  }
   0xb   :  { %s848_s16 = smov 0   ;;  %s850_s17 = smov 0  }
   0xc LB: > { %s534_s18 = sadd.s32 4294967295, %s811_s17   ;;  %s535_s19 = sadd.s32 4294967294, %s811_s17   ;;  %s811_s17 = sphi %s850_s17, %s26_s17   ;;  %s807_s16 = sphi %s848_s16, %s1121_s16   ;;  %s803_s15 = sphi %s846_s15, %s1120_s15   ;;  %s799_s14 = sphi %s844_s14, %s1119_s14   ;;  %s795_s13 = sphi %s842_s13, %s1118_s13   ;;  %s791_s12 = sphi %s840_s12, %s1117_s12  }
   0xd   : > { %s45_s20 = sadd.s32 1, %s807_s16  ;;  %s56_s21 = sadd.s32 1, %s799_s14 }
   0xe   : > { %p47_p0 = scmp.ge.s32.totalorder %s45_s20, 2  ;;  %p63_p1 = scmp.ne.s32.totalorder %s799_s14, %s795_s13 }
   0xf   : > { %p64_p2 = scmp.eq.s32.totalorder %s811_s17, 0  ;;  %p69_p3 = scmp.ne.s32.totalorder %s795_s13, %s791_s12 }
  0x10   : > { %s1123_s20 = smov (%p47_p0, %s45_s20), 0  ;;  %p70_p5 = scmp.eq.s32.totalorder %s534_s18, 0 }
  0x11   : > { %p881_p4 = por %p64_p2, %p63_p1  ;;  %s51_s23 = ssub.s32 %s807_s16, %s1123_s20 }
  0x12   : > { %p125_p6 = scmp.eq.s32.totalorder %s534_s18, 1  ;;  %p54_p7 = scmp.eq.s32.totalorder %s51_s23, 0 }
  0x13   : > { %p887_p8 = por %p70_p5, %p69_p3  ;;  %p131_p10 = scmp.eq.s32.totalorder %s535_s19, 1 }
  0x14   : > { %p891_p9 = por %p125_p6, %p63_p1  ;;  %p578_p13 = scmp.lt.s32.totalorder %s811_s17, 2 }
  0x15   : > { %s896_s26 = scalar_select %p54_p7, %s799_s14, %s56_s21  }
  0x16   : > { %p898_p11 = por %p131_p10, %p69_p3  ;;  %s905_s28 = sand.u32 1, %s799_s14  }
  0x17   : > { %s538_s29 = sshll.u32 %s905_s28, 3  ;;  %s555_s30 = sshll.u32 %s807_s16, 7 }
  0x18   : > { %s1111_s0 = sld [smem:[#allocation14_spill]]  ;;  %s183_s7 = scalar_lea.vmem [#allocation2], %s538_s29 }
  0x19   : > { %s192_s8 = sshll.u32 %s183_s7, 4  ;;  %p914_p0 = pnand %p578_p13, %p881_p4  ;;  %s193_s8 = int_to_ptr.vmem [resolvable:$true] %s192_s8 }
  0x1a   : > { %p543_p1 = scmp.ge.s32.totalorder %s811_s17, 1  ;;  %s180_s10 = scalar_lea.sflag [#allocation3], %s905_s28 }
  0x1b   : > { %p643_p2 = pneg %p914_p0  ;;  %s654_s11 = scalar_lea.vmem %s193_s8, 128 }
  0x1c   : > { %p655_p3 = scmp.ne.s32.totalorder %s193_s8, %s654_s11  ;;  %s813_s18 = smov [#allocation2]  }
  0x1d   : > { %s659_s19 = sshll.u32 %s813_s18, 4  ;;  %s660_s19 = int_to_ptr.vmem [resolvable:$false] %s659_s19 }
  0x1e   : > { %s191_s6 = scalar_lea.hbm %s1111_s0, %s555_s30  ;;  %p657_p5 = pnand %p655_p3, %p643_p2 }
  0x1f   : > { %s661_s21 = scalar_lea.vmem %s660_s19, 256  ;;  %p662_p4 = scmp.lt.s32.totalorder %s193_s8, %s660_s19 }
  0x20   : > { %p658_p6 = pneg %p657_p5  ;;  %p663_p7 = scmp.lt.s32.totalorder %s661_s21, %s654_s11 }
  0x22   : > { %p664_p10 = por %p663_p7, %p662_p4 }
  0x24   : > { %p665_p13 = pnand %p664_p10, %p658_p6 }
  0x26   : > { %668 = shalt.err (!%p665_p13)
}
  0x27   : > { %s814_s22 = smov 32   ;;  %s815_s23 = smov 2  }
  0x28   : > { %567 = dma.hbm_to_vmem [thread:$0]  (!%p914_p0), %s191_s6, 128, %s193_s8, %s180_s10, %s814_s22, %s814_s22, %s815_s23  }
  0x29   : > { %p220_p3 = scmp.lt.s32.totalorder %s811_s17, 3  ;;  %s541_s29 = sshll.u32 %s905_s28, 1 }
  0x2a   : > { %s542_s30 = sshll.u32 %s807_s16, 5  ;;  %s206_s18 = scalar_lea.vmem [#allocation5], %s541_s29 }
  0x2b   : > { %p932_p5 = pnand %p543_p1, %p220_p3  ;;  %s213_s11 = scalar_lea.hbm %s1103_s1, %s542_s30 }
  0x2c   : > { %s215_s19 = sshll.u32 %s206_s18, 4  ;;  %s203_s21 = scalar_lea.sflag [#allocation6], %s905_s28  ;;  %s216_s19 = int_to_ptr.vmem [resolvable:$true] %s215_s19 }
  0x2d   : > { %s682_s0 = scalar_lea.vmem %s216_s19, 32  ;;  %s816_s6 = smov [#allocation5]  }
  0x2e   : > { %p683_p6 = scmp.ne.s32.totalorder %s216_s19, %s682_s0  ;;  %s687_s8 = sshll.u32 %s816_s6, 4  ;;  %s688_s8 = int_to_ptr.vmem [resolvable:$false] %s687_s8 }
  0x2f   : > { %s689_s10 = scalar_lea.vmem %s688_s8, 64  ;;  %p690_p1 = scmp.lt.s32.totalorder %s216_s19, %s688_s8 }
  0x30   : > { %p685_p4 = pnand %p683_p6, %p643_p2  ;;  %p691_p10 = scmp.lt.s32.totalorder %s689_s10, %s682_s0 }
  0x32   : > { %p686_p7 = pneg %p685_p4  ;;  %p692_p13 = por %p691_p10, %p690_p1 }
  0x34   : > { %p693_p3 = pnand %p692_p13, %p686_p7 }
  0x36   : > { %696 = shalt.err (!%p693_p3)
}
  0x37   : > { %570 = dma.hbm_to_vmem [thread:$0]  (!%p914_p0), %s213_s11, 32, %s216_s19, %s203_s21  }
  0x38   : > { %224 = sbr.rel (%p932_p5) target bundleno = 149 (0x95), region = 28  ;;  %s948_s28 = sand.u32 (!%p932_p5), 1, %s795_s13  }
  0x39   : > { %s544_s22 = sshll.u32 (!%p932_p5), %s948_s28, 3  ;;  %s227_s23 = scalar_lea.sflag (!%p932_p5), [#allocation3], %s948_s28 }
  0x3a   : > { %s230_s29 = scalar_lea.vmem (!%p932_p5), [#allocation2], %s544_s22 }
  0x3d   : > { %774 = dma.done.wait (%p887_p8), %s227_s23, 128  }
  0x3e   : > { %776 = vsyncadd (%p887_p8), %s227_s23, 4294967168  ;;  %s545_s0 = sshll.u32 %s948_s28, 1  ;;  %s236_s9 = scalar_lea.sflag [#allocation6], %s948_s28 }
  0x3f   : > { %s239_s30 = scalar_lea.vmem [#allocation5], %s545_s0 }
  0x40   : > { %778 = dma.done.wait (%p887_p8), %s236_s9, 32  }
  0x41   : > { %780 = vsyncadd (%p887_p8), %s236_s9, 4294967264  ;;  %v286_v0 = vlaneseq  ;;  %s962_s4 = scalar_lea.vmem [#allocation7], %s545_s0  ;;  %v817_v1 = vmov 0.0   ;;  %s965_s5 = scalar_lea.vmem [#allocation8], %s545_s0  ;;  %vm302_vm0 = vcmask 1041408  }
  0x42   : > { %279 = vst [vmem:[%s962_s4] sm:$0x3] %v817_v1  ;;  %280 = vst [vmem:[%s965_s5] sm:$0x3] %v817_v1  ;;  %v968_v6 = vld [vmem:[%s230_s29] sm:$0x3]  ;;  %v970_v7 = vld [vmem:[%s230_s29 + $0x2] sm:$0x3] }
  0x43   : > { %v287_v2 = vshrl.u32 %v286_v0, 7  ;;  %v289_v3 = vand.u32 127, %v286_v0  ;;  %v972_v8 = vld [vmem:[%s230_s29 + $0x4] sm:$0x3]  ;;  %v974_v9 = vld [vmem:[%s230_s29 + $0x6] sm:$0x3] }
  0x44   : > { %v976_v10 = vld [vmem:[%s239_s30] sm:$0x3]  ;;  %v303_v11 = vsel %vm302_vm0, %v968_v6, -inf  ;;  %v304_v12 = vsel %vm302_vm0, %v970_v7, -inf  ;;  %v305_v13 = vsel %vm302_vm0, %v972_v8, -inf  ;;  %v306_v14 = vsel %vm302_vm0, %v974_v9, -inf }
  0x45   : > { %v293_v4 = vmul.u32 128, %v287_v2  ;;  %vm296_vm2 = vcmp.ne.s32.totalorder %v976_v10, 4294967196  ;;  %vm298_vm3 = vcmp.ge.s32.totalorder %v976_v10, 0  ;;  %vm300_vm4 = vcmp.lt.s32.totalorder %v976_v10, 4  ;;  %s551_s24 = sshll.u32 %s803_s15, 5  ;;  %s391_s7 = sshll.u32 %s965_s5, 4  ;;  %s1015_s7 = int_to_ptr.vmem [resolvable:$true] %s391_s7 }
  0x46   : > { %v307_v15 = vmax.f32 %v303_v11, %v304_v12  ;;  %v308_v16 = vmax.f32 %v305_v13, %v306_v14  ;;  %s1013_s19 = scalar_lea.hbm %s1105_s3, %s551_s24  ;;  %s363_s21 = scalar_lea.sflag [#allocation9], %s948_s28 }
  0x47   : > { %v294_v5 = vadd.s32 %v293_v4, %v289_v3  ;;  %s697_s6 = scalar_lea.vmem %s1015_s7, 32  ;;  %s818_s8 = smov [#allocation8]  }
  0x48   : > { %v993_v18 = vmax.f32 %v307_v15, %v308_v16  ;;  %p698_p8 = scmp.ne.s32.totalorder %s1015_s7, %s697_s6  ;;  %s701_s10 = sshll.u32 %s818_s8, 4  ;;  %s702_s10 = int_to_ptr.vmem [resolvable:$false] %s701_s10 }
  0x49   : > { %vm295_vm1 = vcmp.lt.s32.totalorder %v294_v5, 256  ;;  %v354_v19 = vld [vmem:[%s965_s5] sm:$0x3]  ;;  %s703_s22 = scalar_lea.vmem %s702_s10, 64  ;;  %p704_p5 = scmp.lt.s32.totalorder %s1015_s7, %s702_s10 }
  0x4a   : > { %vm297_vm5 = vmand %vm295_vm1, %vm296_vm2  ;;  %v310_v21 = vsub.f32 %v968_v6, %v993_v18  ;;  %v311_v22 = vsub.f32 %v970_v7, %v993_v18  ;;  %v312_v23 = vsub.f32 %v972_v8, %v993_v18  ;;  %v313_v24 = vsub.f32 %v974_v9, %v993_v18  ;;  %p699_p0 = pnand %p698_p8, %p891_p9  ;;  %p705_p6 = scmp.lt.s32.totalorder %s703_s22, %s697_s6 }
  0x4b   : > { %vm299_vm6 = vmand %vm297_vm5, %vm298_vm3 }
  0x4c   : > { %vm989_vm7 = vmand %vm299_vm6, %vm300_vm4  ;;  %v314_v26 = vmul.f32 1.442695, %v310_v21  ;;  %v316_v27 = vmul.f32 1.442695, %v311_v22  ;;  %v318_v28 = vmul.f32 1.442695, %v312_v23  ;;  %p700_p2 = pneg %p699_p0  ;;  %p706_p4 = por %p705_p6, %p704_p5 }
  0x4d   : > { %v548_v20 = vsel %vm989_vm7, 1.0, %v817_v1  ;;  %v320_v29 = vmul.f32 1.442695, %v313_v24 }
  0x4e   : > { %v355_v25 = vadd.f32 %v548_v20, %v354_v19  ;;  %631 = vpow2.f32 %v314_v26  ;;  %p707_p7 = pnand %p706_p4, %p700_p2 }
  0x50   : > { %356 = vst [vmem:[%s965_s5] sm:$0x3] %v355_v25 }
  0x51   : > { %710 = shalt.err (!%p707_p7)
}
  0x52   : > { %s711_s23 = scalar_lea.hbm %s1013_s19, 32  ;;  %s715_s9 = scalar_lea.hbm %s1105_s3, 64 }
  0x53   : > { %p712_p1 = scmp.ne.s32.totalorder %s1013_s19, %s711_s23  ;;  %p716_p3 = scmp.lt.s32.totalorder %s1013_s19, %s1105_s3 }
  0x54   : > { %p717_p8 = scmp.lt.s32.totalorder %s715_s9, %s711_s23 }
  0x55   : > { %p713_p10 = pnand %p712_p1, %p891_p9 }
  0x56   : > { %p718_p0 = por %p717_p8, %p716_p3 }
  0x57   : > { %p714_p13 = pneg %p713_p10 }
  0x59   : > { %p719_p2 = pnand %p718_p0, %p714_p13 }
  0x5b   : > { %722 = shalt.err (!%p719_p2)
}
  0x5c   : > { %561 = dma.vmem_to_hbm [thread:$0]  (%p891_p9), %s1015_s7, 32, %s1013_s19, %s363_s21   ;;  %633 = vpow2.f32 %v316_v27  ;;  %v632_v30 = vpop.eup %631  ;;  %vm332_vm8 = vcmp.eq.s32.totalorder %v976_v10, 0  ;;  %vm333_vm9 = vcmp.eq.s32.totalorder %v976_v10, 1  ;;  %vm334_vm10 = vcmp.eq.s32.totalorder %v976_v10, 2  ;;  %v351_v56 = vld [vmem:[%s962_s4] sm:$0x3] }
  0x5d   : > { %635 = vpow2.f32 %v318_v28  ;;  %v322_v32 = vsel %vm302_vm0, %v632_v30, 0.0  ;;  %v336_v41 = vsel %vm332_vm8, %v968_v6, 0.0  ;;  %v337_v42 = vsel %vm333_vm9, %v970_v7, 0.0  ;;  %s377_s7 = sshll.u32 %s962_s4, 4  ;;  %s375_s19 = scalar_lea.hbm %s1104_s2, %s551_s24  ;;  %s378_s7 = int_to_ptr.vmem [resolvable:$true] %s377_s7 }
  0x5e   : > { %637 = vpow2.f32 %v320_v29  ;;  %v340_v43 = vsel %vm302_vm0, %v336_v41, 0.0  ;;  %v341_v44 = vsel %vm302_vm0, %v337_v42, 0.0  ;;  %v338_v45 = vsel %vm334_vm10, %v972_v8, 0.0  ;;  %s358_s21 = scalar_lea.sflag [#allocation4], %s948_s28  ;;  %s723_s6 = scalar_lea.vmem %s378_s7, 32 }
  0x5f   : > { %vm335_vm11 = vcmp.eq.s32.totalorder %v976_v10, 3  ;;  %v342_v46 = vadd.f32 %v341_v44, %v340_v43  ;;  %v343_v47 = vsel %vm302_vm0, %v338_v45, 0.0  ;;  %p724_p5 = scmp.ne.s32.totalorder %s378_s7, %s723_s6  ;;  %s819_s8 = smov [#allocation7]  }
  0x60   : > { %v339_v48 = vsel %vm335_vm11, %v974_v9, 0.0  ;;  %s727_s10 = sshll.u32 %s819_s8, 4  ;;  %s728_s10 = int_to_ptr.vmem [resolvable:$false] %s727_s10 }
  0x61   : > { %v344_v49 = vadd.f32 %v343_v47, %v342_v46  ;;  %v345_v50 = vsel %vm302_vm0, %v339_v48, 0.0  ;;  %p725_p6 = pnand %p724_p5, %p891_p9  ;;  %s729_s22 = scalar_lea.vmem %s728_s10, 64 }
  0x62   : > { %p730_p7 = scmp.lt.s32.totalorder %s378_s7, %s728_s10  ;;  %p731_p1 = scmp.lt.s32.totalorder %s729_s22, %s723_s6 }
  0x63   : > { %v346_v53 = vadd.f32 %v345_v50, %v344_v49  ;;  %p726_p4 = pneg %p725_p6 }
  0x64   : > { %p732_p10 = por %p731_p1, %p730_p7 }
  0x66   : > { %p733_p13 = pnand %p732_p10, %p726_p4 }
  0x69   : > { %v634_v31 = vpop.eup %633 }
  0x6a   : > { %v636_v33 = vpop.eup %635  ;;  %v323_v34 = vsel %vm302_vm0, %v634_v31, 0.0 }
  0x6b   : > { %v638_v35 = vpop.eup %637  ;;  %v324_v36 = vadd.f32 %v323_v34, %v322_v32  ;;  %v325_v37 = vsel %vm302_vm0, %v636_v33, 0.0 }
  0x6c   : > { %v327_v38 = vsel %vm302_vm0, %v638_v35, 0.0 }
  0x6d   : > { %v326_v39 = vadd.f32 %v325_v37, %v324_v36 }
  0x6f   : > { %v328_v40 = vadd.f32 %v327_v38, %v326_v39 }
  0x71   : > { %639 = vlog2.f32 %v328_v40 }
  0x7e   : > { %v640_v51 = vpop.eup %639 }
  0x7f   : > { %v330_v52 = vmul.f32 0.6931472, %v640_v51 }
  0x81   : > { %v331_v54 = vadd.f32 %v330_v52, %v993_v18 }
  0x83   : > { %v347_v55 = vsub.f32 %v331_v54, %v346_v53 }
  0x85   : > { %v348_v57 = vsel %vm989_vm7, %v347_v55, 0.0 }
  0x86   : > { %v352_v58 = vadd.f32 %v351_v56, %v348_v57 }
  0x88   : > { %353 = vst [vmem:[%s962_s4] sm:$0x3] %v352_v58 }
  0x89   : > { %736 = shalt.err (!%p733_p13)
}
  0x8a   : > { %s737_s15 = scalar_lea.hbm %s375_s19, 32  ;;  %s741_s24 = scalar_lea.hbm %s1104_s2, 64 }
  0x8b   : > { %p738_p3 = scmp.ne.s32.totalorder %s375_s19, %s737_s15  ;;  %p742_p2 = scmp.lt.s32.totalorder %s375_s19, %s1104_s2 }
  0x8c   : > { %p743_p5 = scmp.lt.s32.totalorder %s741_s24, %s737_s15 }
  0x8d   : > { %p739_p8 = pnand %p738_p3, %p891_p9 }
  0x8e   : > { %p744_p6 = por %p743_p5, %p742_p2 }
  0x8f   : > { %p740_p0 = pneg %p739_p8 }
  0x91   : > { %p745_p12 = pnand %p744_p6, %p740_p0 }
  0x93   : > { %748 = shalt.err (!%p745_p12)
}
  0x94   : > { %560 = dma.vmem_to_hbm [thread:$0]  (%p891_p9), %s378_s7, 32, %s375_s19, %s358_s21  }
  0x95 PF: > { %s403_s0 = sand.u32 1, %s791_s12   ;;  %p1116_p4 = scmp.ge.s32.totalorder %s811_s17, 2 }
  0x96   : > { %s404_s9 = scalar_lea.sflag [#allocation4], %s403_s0 }
  0x97   : > { %p572_p7 = pnand %p1116_p4, %p898_p11 }
  0x99   : > { %p573_p1 = pneg %p572_p7 }
  0x9b   : > { %782 = dma.done.wait (%p573_p1), %s404_s9, 32  }
  0x9c   : > { %784 = vsyncadd (%p573_p1), %s404_s9, 4294967264  ;;  %s413_s30 = scalar_lea.sflag [#allocation9], %s403_s0 }
  0x9d   : > { %786 = dma.done.wait (%p573_p1), %s413_s30, 32  }
  0x9e   : > { %788 = vsyncadd (%p573_p1), %s413_s30, 4294967264  ;;  %s26_s17 = sadd.s32 1, %s811_s17   ;;  %s1117_s12 = smov %s795_s13 }
  0x9f   : > { %p23_p12 = scmp.ge.s32.totalorder %s26_s17, 4   ;;  %s1118_s13 = smov %s799_s14 }
  0xa0   : > { %s1119_s14 = smov %s896_s26  ;;  %s1120_s15 = smov %s807_s16 }
  0xa1   : > { %s1121_s16 = smov %s1123_s20  ;;  %25 = sbr.rel (!%p23_p12) target bundleno = 12 (0xc), region = 107 }
  0xa6   :  { %418 = vsyncpa [#allocation3], 1 }
  0xa7   :  { %420 = vsyncpa [#allocation3 + $0x1], 1 }
  0xa8   :  { %421 = vsyncpa [#allocation6], 1 }
  0xa9   :  { %423 = vsyncpa [#allocation6 + $0x1], 1 }
  0xaa   :  { %424 = vsyncpa [#allocation4], 1 }
  0xab   :  { %426 = vsyncpa [#allocation4 + $0x1], 1 }
  0xac   :  { %427 = vsyncpa [#allocation9], 1 }
  0xad   :  { %429 = vsyncpa [#allocation9 + $0x1], 1 }

</bundles_post_ra>
